<compile_context>
chip_gen: v7x
topology: tpu7x:2x2x1
jax: 0.10.0
libtpu: 0.0.40
codegen_flags: <defaults>
</compile_context>

<pallas_src>
import functools

import jax
import jax.numpy as jnp
from jax.experimental import pallas as pl
from jax.experimental.pallas import tpu as pltpu


# ------------------------------ fused kernel ---------------------------------

def _fused_tcn_kernel(x_ref, *refs, k, block_cfg, n_mlp, L, max_pad):
    """One grid step processes one batch element end-to-end.

    refs = (param refs in wrapper order ..., o_ref, pad_ref)
    block_cfg: tuple of (dilation, cin, cout, has_down) per TemporalBlock.
    """
    o_ref = refs[-2]
    pad_ref = refs[-1]                       # VMEM scratch (L + max_pad, c_max)
    params = refs[:-2]
    it = iter(params)

    # Zero the causal left-padding rows once per grid step. Activation writes
    # below never touch rows [0, max_pad), so they stay zero for every conv in
    # every block. Kept UNconditional (not gated on program_id == 0) so it is
    # correct when the "parallel" batch axis is split across TensorCores and
    # each core owns a private scratch buffer.
    if max_pad > 0:
        pad_ref[pl.ds(0, max_pad), :] = jnp.zeros(
            (max_pad, pad_ref.shape[1]), jnp.float32)

    def causal_conv(h_in, w_ref, b_ref, dil, cin, cout, relu):
        """Conv1d(pad=(k-1)*dil, dilation=dil) -> Chomp1d -> [ReLU]."""
        p = (k - 1) * dil
        # Stage the activation behind the zero pad rows, read k shifted windows.
        pad_ref[pl.ds(max_pad, L), pl.ds(0, cin)] = h_in
        # Seed the accumulator with the broadcast bias (saves a separate add).
        acc = jnp.broadcast_to(b_ref[...].astype(jnp.float32), (L, cout))
        for j in range(k):
            start = max_pad - p + j * dil             # static per tap, >= 0
            xj = pad_ref[pl.ds(start, L), pl.ds(0, cin)]        # (L, cin)
            acc = acc + jnp.dot(xj, w_ref[j],
                                preferred_element_type=jnp.float32)
        if relu:
            acc = jnp.maximum(acc, 0.0)
        return acc

    # ---- TCN blocks (all intermediates stay in VMEM / vregs) -----------------
    h = x_ref[0].astype(jnp.float32)                            # (L, C_in)
    for (dil, cin, cout, has_down) in block_cfg:
        w1, b1, w2, b2 = next(it), next(it), next(it), next(it)
        if has_down:
            wd, bd = next(it), next(it)
        out = causal_conv(h, w1, b1, dil, cin, cout, relu=True)     # conv1+ReLU
        out = causal_conv(out, w2, b2, dil, cout, cout, relu=True)  # conv2+ReLU
        if has_down:                                  # 1x1 downsample (pointwise)
            res = jnp.broadcast_to(bd[...].astype(jnp.float32), (L, cout))
            res = res + jnp.dot(h, wd[0], preferred_element_type=jnp.float32)
        else:
            res = h
        h = jnp.maximum(out + res, 0.0)               # residual + final ReLU

    # ---- composite MLP (fused, per-timestep) ---------------------------------
    for li in range(n_mlp):
        w, bias = next(it), next(it)
        h = jnp.dot(h, w[...], preferred_element_type=jnp.float32)
        h = h + bias[...].astype(jnp.float32)
        if li < n_mlp - 1:
            h = jnp.maximum(h, 0.0)

    o_ref[0] = h.astype(o_ref.dtype)


def temporal_conv_static_a_forward(x_ncw, params):
    """x_ncw: (B, C_in, L) as in PyTorch. Returns (B, L, output_class)."""
    B, C_in, L = x_ncw.shape
    # One-time relayout to channel-last; PyTorch's final .transpose(1, 2) is
    # then a no-op (we are already (B, L, C) going into the MLP).
    x = jnp.transpose(x_ncw, (0, 2, 1))

    blocks = params['blocks']
    comp = params['composite']
    k = blocks[0]['w1'].shape[0]
    max_pad = max((k - 1) * blk['dilation'] for blk in blocks)
    c_max = max([C_in] + [blk['w1'].shape[2] for blk in blocks])
    out_class = comp[-1][0].shape[1]

    inputs = [x]
    in_specs = [pl.BlockSpec((1, L, C_in), lambda b: (b, 0, 0))]
    block_cfg = []

    def add_param(p):
        inputs.append(p)
        # Constant index_map -> the parameter is DMA'd into VMEM exactly once.
        in_specs.append(pl.BlockSpec(p.shape, lambda b, _r=p.ndim: (0,) * _r))

    for blk in blocks:
        cin, cout = blk['w1'].shape[1], blk['w1'].shape[2]
        has_down = blk['w_down'] is not None
        block_cfg.append((blk['dilation'], cin, cout, has_down))
        add_param(blk['w1'])
        add_param(blk['b1'].reshape(1, -1))
        add_param(blk['w2'])
        add_param(blk['b2'].reshape(1, -1))
        if has_down:
            add_param(blk['w_down'])
            add_param(blk['b_down'].reshape(1, -1))
    for (w, bias) in comp:
        add_param(w)
        add_param(bias.reshape(1, -1))

    kernel = functools.partial(
        _fused_tcn_kernel, k=k, block_cfg=tuple(block_cfg),
        n_mlp=len(comp), L=L, max_pad=max_pad)

    return pl.pallas_call(
        kernel,
        out_shape=jax.ShapeDtypeStruct((B, L, out_class), x.dtype),
        grid=(B,),
        in_specs=in_specs,
        out_specs=pl.BlockSpec((1, L, out_class), lambda b: (b, 0, 0)),
        scratch_shapes=[pltpu.VMEM((L + max_pad, c_max), jnp.float32)],
        compiler_params=pltpu.CompilerParams(
            dimension_semantics=("parallel",)),
    )(*inputs)


# ------------------------- parameters (init only) -----------------------------

def init_params(key, num_inputs, num_channels, kernel_size, c_param, output_class):
    keys = iter(jax.random.split(key, 64))
    blocks = []
    in_ch = num_inputs
    for i, out_ch in enumerate(num_channels):
        d = 2 ** i
        blk = {
            'dilation': d,
            # conv weights ~ N(0, 0.01), stored channel-last as (k, Cin, Cout)
            'w1': 0.01 * jax.random.normal(next(keys), (kernel_size, in_ch, out_ch), jnp.float32),
            'b1': 0.01 * jax.random.normal(next(keys), (out_ch,), jnp.float32),
            'w2': 0.01 * jax.random.normal(next(keys), (kernel_size, out_ch, out_ch), jnp.float32),
            'b2': 0.01 * jax.random.normal(next(keys), (out_ch,), jnp.float32),
        }
        if in_ch != out_ch:  # downsample = Conv1d(in_ch, out_ch, 1)
            blk['w_down'] = 0.01 * jax.random.normal(next(keys), (1, in_ch, out_ch), jnp.float32)
            blk['b_down'] = 0.01 * jax.random.normal(next(keys), (out_ch,), jnp.float32)
        else:
            blk['w_down'] = None
            blk['b_down'] = None
        blocks.append(blk)
        in_ch = out_ch
    # composite MLP: num_channels[-1] -> c_param[0] -> ... -> c_param[-2] -> output_class
    composite = []
    dims = [num_channels[-1]] + list(c_param[:-1]) + [output_class]
    for a, bdim in zip(dims[:-1], dims[1:]):
        w = 0.1 * jax.random.normal(next(keys), (a, bdim), jnp.float32)
        bb = 0.1 * jax.random.normal(next(keys), (bdim,), jnp.float32)
        composite.append((w, bb))
    return {'blocks': blocks, 'composite': composite}


# --------------------------- pure-JAX reference -------------------------------

def _ref_conv(h_ncw, w_kio, bias, dilation, k):
    w_oik = jnp.transpose(w_kio, (2, 1, 0))  # (Cout, Cin, k)
    p = (k - 1) * dilation
    y = jax.lax.conv_general_dilated(
        h_ncw, w_oik, window_strides=(1,), padding=[(p, p)],
        rhs_dilation=(dilation,), dimension_numbers=('NCH', 'OIH', 'NCH'))
    if p > 0:
        y = y[:, :, :y.shape[2] - p]  # Chomp1d
    return y + bias.reshape(1, -1, 1)


def ref_forward(x_ncw, params):
    x = x_ncw
    for blk in params['blocks']:
        k = blk['w1'].shape[0]
        d = blk['dilation']
        out = jax.nn.relu(_ref_conv(x, blk['w1'], blk['b1'], d, k))
        out = jax.nn.relu(_ref_conv(out, blk['w2'], blk['b2'], d, k))
        res = x if blk['w_down'] is None else _ref_conv(x, blk['w_down'], blk['b_down'], 1, 1)
        x = jax.nn.relu(out + res)
    x = jnp.transpose(x, (0, 2, 1))
    n = len(params['composite'])
    for idx, (w, bias) in enumerate(params['composite']):
        x = x @ w + bias
        if idx < n - 1:
            x = jax.nn.relu(x)
    return x


# ----------------------------------- main -------------------------------------

if __name__ == "__main__":
    key = jax.random.PRNGKey(0)
    kx, kp = jax.random.split(key)

    # module hyper-params (small, consistent with __init__)
    B, num_inputs, L = 2, 4, 16
    num_channels = [8, 8]
    kernel_size = 3
    dropout = 0.2            # identity at inference
    c_param = [32, 16, 0.1]  # last entry = composite dropout prob
    output_class = 5
    use_encode = False       # forward() never calls self.encode

    x = jax.random.normal(kx, (B, num_inputs, L), jnp.float32)  # NCW like PyTorch
    params = init_params(kp, num_inputs, num_channels, kernel_size, c_param, output_class)

    out = temporal_conv_static_a_forward(x, params)
    out = jax.block_until_ready(out)

    ref = ref_forward(x, params)
    assert out.shape == (B, L, output_class), out.shape
    assert jnp.allclose(out, ref, atol=1e-5, rtol=1e-5), float(jnp.max(jnp.abs(out - ref)))

    print("KERNEL_OK")
</pallas_src>

<mosaic_0001>
module attributes {stable_mosaic.version = 11 : i64} {
  func.func @_fused_tcn_kernel(%arg0: i32, %arg1: memref<1x16x4xf32, #tpu.memory_space<vmem>>, %arg2: memref<3x4x8xf32, #tpu.memory_space<vmem>>, %arg3: memref<1x8xf32, #tpu.memory_space<vmem>>, %arg4: memref<3x8x8xf32, #tpu.memory_space<vmem>>, %arg5: memref<1x8xf32, #tpu.memory_space<vmem>>, %arg6: memref<1x4x8xf32, #tpu.memory_space<vmem>>, %arg7: memref<1x8xf32, #tpu.memory_space<vmem>>, %arg8: memref<3x8x8xf32, #tpu.memory_space<vmem>>, %arg9: memref<1x8xf32, #tpu.memory_space<vmem>>, %arg10: memref<3x8x8xf32, #tpu.memory_space<vmem>>, %arg11: memref<1x8xf32, #tpu.memory_space<vmem>>, %arg12: memref<8x32xf32, #tpu.memory_space<vmem>>, %arg13: memref<1x32xf32, #tpu.memory_space<vmem>>, %arg14: memref<32x16xf32, #tpu.memory_space<vmem>>, %arg15: memref<1x16xf32, #tpu.memory_space<vmem>>, %arg16: memref<16x5xf32, #tpu.memory_space<vmem>>, %arg17: memref<1x5xf32, #tpu.memory_space<vmem>>, %arg18: memref<1x16x5xf32, #tpu.memory_space<vmem>>, %arg19: memref<20x8xf32, #tpu.memory_space<vmem>>) attributes {dimension_semantics = [#tpu.dimension_semantics<parallel>], iteration_bounds = array<i64: 2>, scalar_prefetch = 0 : i64, scratch_operands = 1 : i64, tpu.core_type = #tpu.core_type<tc>, window_params = [{transform_indices = @transform_0, window_bounds = array<i64: 1, 16, 4>}, {pipeline_mode = #tpu.pipeline_mode<synchronous>, transform_indices = @transform_1, window_bounds = array<i64: 3, 4, 8>}, {pipeline_mode = #tpu.pipeline_mode<synchronous>, transform_indices = @transform_2, window_bounds = array<i64: 1, 8>}, {pipeline_mode = #tpu.pipeline_mode<synchronous>, transform_indices = @transform_3, window_bounds = array<i64: 3, 8, 8>}, {pipeline_mode = #tpu.pipeline_mode<synchronous>, transform_indices = @transform_4, window_bounds = array<i64: 1, 8>}, {pipeline_mode = #tpu.pipeline_mode<synchronous>, transform_indices = @transform_5, window_bounds = array<i64: 1, 4, 8>}, {pipeline_mode = #tpu.pipeline_mode<synchronous>, transform_indices = @transform_6, window_bounds = array<i64: 1, 8>}, {pipeline_mode = #tpu.pipeline_mode<synchronous>, transform_indices = @transform_7, window_bounds = array<i64: 3, 8, 8>}, {pipeline_mode = #tpu.pipeline_mode<synchronous>, transform_indices = @transform_8, window_bounds = array<i64: 1, 8>}, {pipeline_mode = #tpu.pipeline_mode<synchronous>, transform_indices = @transform_9, window_bounds = array<i64: 3, 8, 8>}, {pipeline_mode = #tpu.pipeline_mode<synchronous>, transform_indices = @transform_10, window_bounds = array<i64: 1, 8>}, {pipeline_mode = #tpu.pipeline_mode<synchronous>, transform_indices = @transform_11, window_bounds = array<i64: 8, 32>}, {pipeline_mode = #tpu.pipeline_mode<synchronous>, transform_indices = @transform_12, window_bounds = array<i64: 1, 32>}, {pipeline_mode = #tpu.pipeline_mode<synchronous>, transform_indices = @transform_13, window_bounds = array<i64: 32, 16>}, {pipeline_mode = #tpu.pipeline_mode<synchronous>, transform_indices = @transform_14, window_bounds = array<i64: 1, 16>}, {pipeline_mode = #tpu.pipeline_mode<synchronous>, transform_indices = @transform_15, window_bounds = array<i64: 16, 5>}, {pipeline_mode = #tpu.pipeline_mode<synchronous>, transform_indices = @transform_16, window_bounds = array<i64: 1, 5>}, {transform_indices = @transform_17, window_bounds = array<i64: 1, 16, 5>}]} {
    %cst = arith.constant 0.000000e+00 : f32
    %0 = vector.broadcast %cst : f32 to vector<4x8xf32>
    %c0 = arith.constant 0 : index
    %c0_0 = arith.constant 0 : index
    %1 = vector.load %arg19[%c0, %c0_0] : memref<20x8xf32, #tpu.memory_space<vmem>>, vector<4x8xf32>
    tpu.vector_store %arg19[%c0, %c0_0], %0 {strides = array<i32>} : memref<20x8xf32, #tpu.memory_space<vmem>>, vector<4x8xf32>,
    %c0_1 = arith.constant 0 : index
    %c0_2 = arith.constant 0 : index
    %c0_3 = arith.constant 0 : index
    %2 = vector.load %arg1[%c0_1, %c0_2, %c0_3] : memref<1x16x4xf32, #tpu.memory_space<vmem>>, vector<1x16x4xf32>
    %3 = vector.shape_cast %2 : vector<1x16x4xf32> to vector<16x4xf32>
    %c4 = arith.constant 4 : index
    %c0_4 = arith.constant 0 : index
    %4 = vector.load %arg19[%c4, %c0_4] : memref<20x8xf32, #tpu.memory_space<vmem>>, vector<16x4xf32>
    tpu.vector_store %arg19[%c4, %c0_4], %3 {strides = array<i32>} : memref<20x8xf32, #tpu.memory_space<vmem>>, vector<16x4xf32>,
    %c0_5 = arith.constant 0 : index
    %c0_6 = arith.constant 0 : index
    %5 = vector.load %arg3[%c0_5, %c0_6] : memref<1x8xf32, #tpu.memory_space<vmem>>, vector<1x8xf32>
    %6 = vector.shape_cast %5 : vector<1x8xf32> to vector<1x8xf32>
    %7 = vector.broadcast %6 : vector<1x8xf32> to vector<16x8xf32>
    %c2 = arith.constant 2 : index
    %c0_7 = arith.constant 0 : index
    %8 = vector.load %arg19[%c2, %c0_7] : memref<20x8xf32, #tpu.memory_space<vmem>>, vector<16x4xf32>
    %c0_8 = arith.constant 0 : index
    %c0_9 = arith.constant 0 : index
    %c0_10 = arith.constant 0 : index
    %9 = vector.load %arg2[%c0_8, %c0_9, %c0_10] : memref<3x4x8xf32, #tpu.memory_space<vmem>>, vector<1x4x8xf32>
    %10 = vector.shape_cast %9 : vector<1x4x8xf32> to vector<4x8xf32>
    %cst_11 = arith.constant dense<0.000000e+00> : vector<16x8xf32>
    %11 = tpu.matmul %8, %10, %cst_11 {dimension_numbers = #tpu.dot_dimension_numbers<[1], [0], [0], [1], [0, 0, 1, 1], [], []>} : vector<16x4xf32>, vector<4x8xf32>, vector<16x8xf32> -> vector<16x8xf32>
    %12 = arith.addf %7, %11 : vector<16x8xf32>
    %c3 = arith.constant 3 : index
    %c0_12 = arith.constant 0 : index
    %13 = vector.load %arg19[%c3, %c0_12] : memref<20x8xf32, #tpu.memory_space<vmem>>, vector<16x4xf32>
    %c1 = arith.constant 1 : index
    %c0_13 = arith.constant 0 : index
    %c0_14 = arith.constant 0 : index
    %14 = vector.load %arg2[%c1, %c0_13, %c0_14] : memref<3x4x8xf32, #tpu.memory_space<vmem>>, vector<1x4x8xf32>
    %15 = vector.shape_cast %14 : vector<1x4x8xf32> to vector<4x8xf32>
    %cst_15 = arith.constant dense<0.000000e+00> : vector<16x8xf32>
    %16 = tpu.matmul %13, %15, %cst_15 {dimension_numbers = #tpu.dot_dimension_numbers<[1], [0], [0], [1], [0, 0, 1, 1], [], []>} : vector<16x4xf32>, vector<4x8xf32>, vector<16x8xf32> -> vector<16x8xf32>
    %17 = arith.addf %12, %16 : vector<16x8xf32>
    %c4_16 = arith.constant 4 : index
    %c0_17 = arith.constant 0 : index
    %18 = vector.load %arg19[%c4_16, %c0_17] : memref<20x8xf32, #tpu.memory_space<vmem>>, vector<16x4xf32>
    %c2_18 = arith.constant 2 : index
    %c0_19 = arith.constant 0 : index
    %c0_20 = arith.constant 0 : index
    %19 = vector.load %arg2[%c2_18, %c0_19, %c0_20] : memref<3x4x8xf32, #tpu.memory_space<vmem>>, vector<1x4x8xf32>
    %20 = vector.shape_cast %19 : vector<1x4x8xf32> to vector<4x8xf32>
    %cst_21 = arith.constant dense<0.000000e+00> : vector<16x8xf32>
    %21 = tpu.matmul %18, %20, %cst_21 {dimension_numbers = #tpu.dot_dimension_numbers<[1], [0], [0], [1], [0, 0, 1, 1], [], []>} : vector<16x4xf32>, vector<4x8xf32>, vector<16x8xf32> -> vector<16x8xf32>
    %22 = arith.addf %17, %21 : vector<16x8xf32>
    %cst_22 = arith.constant 0.000000e+00 : f32
    %23 = vector.broadcast %cst_22 : f32 to vector<16x8xf32>
    %24 = arith.maximumf %22, %23 : vector<16x8xf32>
    %c4_23 = arith.constant 4 : index
    %c0_24 = arith.constant 0 : index
    %25 = vector.load %arg19[%c4_23, %c0_24] : memref<20x8xf32, #tpu.memory_space<vmem>>, vector<16x8xf32>
    tpu.vector_store %arg19[%c4_23, %c0_24], %24 {strides = array<i32>} : memref<20x8xf32, #tpu.memory_space<vmem>>, vector<16x8xf32>,
    %c0_25 = arith.constant 0 : index
    %c0_26 = arith.constant 0 : index
    %26 = vector.load %arg5[%c0_25, %c0_26] : memref<1x8xf32, #tpu.memory_space<vmem>>, vector<1x8xf32>
    %27 = vector.shape_cast %26 : vector<1x8xf32> to vector<1x8xf32>
    %28 = vector.broadcast %27 : vector<1x8xf32> to vector<16x8xf32>
    %c2_27 = arith.constant 2 : index
    %c0_28 = arith.constant 0 : index
    %29 = vector.load %arg19[%c2_27, %c0_28] : memref<20x8xf32, #tpu.memory_space<vmem>>, vector<16x8xf32>
    %c0_29 = arith.constant 0 : index
    %c0_30 = arith.constant 0 : index
    %c0_31 = arith.constant 0 : index
    %30 = vector.load %arg4[%c0_29, %c0_30, %c0_31] : memref<3x8x8xf32, #tpu.memory_space<vmem>>, vector<1x8x8xf32>
    %31 = vector.shape_cast %30 : vector<1x8x8xf32> to vector<8x8xf32>
    %cst_32 = arith.constant dense<0.000000e+00> : vector<16x8xf32>
    %32 = tpu.matmul %29, %31, %cst_32 {dimension_numbers = #tpu.dot_dimension_numbers<[1], [0], [0], [1], [0, 0, 1, 1], [], []>} : vector<16x8xf32>, vector<8x8xf32>, vector<16x8xf32> -> vector<16x8xf32>
    %33 = arith.addf %28, %32 : vector<16x8xf32>
    %c3_33 = arith.constant 3 : index
    %c0_34 = arith.constant 0 : index
    %34 = vector.load %arg19[%c3_33, %c0_34] : memref<20x8xf32, #tpu.memory_space<vmem>>, vector<16x8xf32>
    %c1_35 = arith.constant 1 : index
    %c0_36 = arith.constant 0 : index
    %c0_37 = arith.constant 0 : index
    %35 = vector.load %arg4[%c1_35, %c0_36, %c0_37] : memref<3x8x8xf32, #tpu.memory_space<vmem>>, vector<1x8x8xf32>
    %36 = vector.shape_cast %35 : vector<1x8x8xf32> to vector<8x8xf32>
    %cst_38 = arith.constant dense<0.000000e+00> : vector<16x8xf32>
    %37 = tpu.matmul %34, %36, %cst_38 {dimension_numbers = #tpu.dot_dimension_numbers<[1], [0], [0], [1], [0, 0, 1, 1], [], []>} : vector<16x8xf32>, vector<8x8xf32>, vector<16x8xf32> -> vector<16x8xf32>
    %38 = arith.addf %33, %37 : vector<16x8xf32>
    %c4_39 = arith.constant 4 : index
    %c0_40 = arith.constant 0 : index
    %39 = vector.load %arg19[%c4_39, %c0_40] : memref<20x8xf32, #tpu.memory_space<vmem>>, vector<16x8xf32>
    %c2_41 = arith.constant 2 : index
    %c0_42 = arith.constant 0 : index
    %c0_43 = arith.constant 0 : index
    %40 = vector.load %arg4[%c2_41, %c0_42, %c0_43] : memref<3x8x8xf32, #tpu.memory_space<vmem>>, vector<1x8x8xf32>
    %41 = vector.shape_cast %40 : vector<1x8x8xf32> to vector<8x8xf32>
    %cst_44 = arith.constant dense<0.000000e+00> : vector<16x8xf32>
    %42 = tpu.matmul %39, %41, %cst_44 {dimension_numbers = #tpu.dot_dimension_numbers<[1], [0], [0], [1], [0, 0, 1, 1], [], []>} : vector<16x8xf32>, vector<8x8xf32>, vector<16x8xf32> -> vector<16x8xf32>
    %43 = arith.addf %38, %42 : vector<16x8xf32>
    %cst_45 = arith.constant 0.000000e+00 : f32
    %44 = vector.broadcast %cst_45 : f32 to vector<16x8xf32>
    %45 = arith.maximumf %43, %44 : vector<16x8xf32>
    %c0_46 = arith.constant 0 : index
    %c0_47 = arith.constant 0 : index
    %46 = vector.load %arg7[%c0_46, %c0_47] : memref<1x8xf32, #tpu.memory_space<vmem>>, vector<1x8xf32>
    %47 = vector.shape_cast %46 : vector<1x8xf32> to vector<1x8xf32>
    %48 = vector.broadcast %47 : vector<1x8xf32> to vector<16x8xf32>
    %c0_48 = arith.constant 0 : index
    %c0_49 = arith.constant 0 : index
    %c0_50 = arith.constant 0 : index
    %49 = vector.load %arg6[%c0_48, %c0_49, %c0_50] : memref<1x4x8xf32, #tpu.memory_space<vmem>>, vector<1x4x8xf32>
    %50 = vector.shape_cast %49 : vector<1x4x8xf32> to vector<4x8xf32>
    %cst_51 = arith.constant dense<0.000000e+00> : vector<16x8xf32>
    %51 = tpu.matmul %3, %50, %cst_51 {dimension_numbers = #tpu.dot_dimension_numbers<[1], [0], [0], [1], [0, 0, 1, 1], [], []>} : vector<16x4xf32>, vector<4x8xf32>, vector<16x8xf32> -> vector<16x8xf32>
    %52 = arith.addf %48, %51 : vector<16x8xf32>
    %53 = arith.addf %45, %52 : vector<16x8xf32>
    %cst_52 = arith.constant 0.000000e+00 : f32
    %54 = vector.broadcast %cst_52 : f32 to vector<16x8xf32>
    %55 = arith.maximumf %53, %54 : vector<16x8xf32>
    %c4_53 = arith.constant 4 : index
    %c0_54 = arith.constant 0 : index
    %56 = vector.load %arg19[%c4_53, %c0_54] : memref<20x8xf32, #tpu.memory_space<vmem>>, vector<16x8xf32>
    tpu.vector_store %arg19[%c4_53, %c0_54], %55 {strides = array<i32>} : memref<20x8xf32, #tpu.memory_space<vmem>>, vector<16x8xf32>,
    %c0_55 = arith.constant 0 : index
    %c0_56 = arith.constant 0 : index
    %57 = vector.load %arg9[%c0_55, %c0_56] : memref<1x8xf32, #tpu.memory_space<vmem>>, vector<1x8xf32>
    %58 = vector.shape_cast %57 : vector<1x8xf32> to vector<1x8xf32>
    %59 = vector.broadcast %58 : vector<1x8xf32> to vector<16x8xf32>
    %c0_57 = arith.constant 0 : index
    %c0_58 = arith.constant 0 : index
    %60 = vector.load %arg19[%c0_57, %c0_58] : memref<20x8xf32, #tpu.memory_space<vmem>>, vector<16x8xf32>
    %c0_59 = arith.constant 0 : index
    %c0_60 = arith.constant 0 : index
    %c0_61 = arith.constant 0 : index
    %61 = vector.load %arg8[%c0_59, %c0_60, %c0_61] : memref<3x8x8xf32, #tpu.memory_space<vmem>>, vector<1x8x8xf32>
    %62 = vector.shape_cast %61 : vector<1x8x8xf32> to vector<8x8xf32>
    %cst_62 = arith.constant dense<0.000000e+00> : vector<16x8xf32>
    %63 = tpu.matmul %60, %62, %cst_62 {dimension_numbers = #tpu.dot_dimension_numbers<[1], [0], [0], [1], [0, 0, 1, 1], [], []>} : vector<16x8xf32>, vector<8x8xf32>, vector<16x8xf32> -> vector<16x8xf32>
    %64 = arith.addf %59, %63 : vector<16x8xf32>
    %c2_63 = arith.constant 2 : index
    %c0_64 = arith.constant 0 : index
    %65 = vector.load %arg19[%c2_63, %c0_64] : memref<20x8xf32, #tpu.memory_space<vmem>>, vector<16x8xf32>
    %c1_65 = arith.constant 1 : index
    %c0_66 = arith.constant 0 : index
    %c0_67 = arith.constant 0 : index
    %66 = vector.load %arg8[%c1_65, %c0_66, %c0_67] : memref<3x8x8xf32, #tpu.memory_space<vmem>>, vector<1x8x8xf32>
    %67 = vector.shape_cast %66 : vector<1x8x8xf32> to vector<8x8xf32>
    %cst_68 = arith.constant dense<0.000000e+00> : vector<16x8xf32>
    %68 = tpu.matmul %65, %67, %cst_68 {dimension_numbers = #tpu.dot_dimension_numbers<[1], [0], [0], [1], [0, 0, 1, 1], [], []>} : vector<16x8xf32>, vector<8x8xf32>, vector<16x8xf32> -> vector<16x8xf32>
    %69 = arith.addf %64, %68 : vector<16x8xf32>
    %c4_69 = arith.constant 4 : index
    %c0_70 = arith.constant 0 : index
    %70 = vector.load %arg19[%c4_69, %c0_70] : memref<20x8xf32, #tpu.memory_space<vmem>>, vector<16x8xf32>
    %c2_71 = arith.constant 2 : index
    %c0_72 = arith.constant 0 : index
    %c0_73 = arith.constant 0 : index
    %71 = vector.load %arg8[%c2_71, %c0_72, %c0_73] : memref<3x8x8xf32, #tpu.memory_space<vmem>>, vector<1x8x8xf32>
    %72 = vector.shape_cast %71 : vector<1x8x8xf32> to vector<8x8xf32>
    %cst_74 = arith.constant dense<0.000000e+00> : vector<16x8xf32>
    %73 = tpu.matmul %70, %72, %cst_74 {dimension_numbers = #tpu.dot_dimension_numbers<[1], [0], [0], [1], [0, 0, 1, 1], [], []>} : vector<16x8xf32>, vector<8x8xf32>, vector<16x8xf32> -> vector<16x8xf32>
    %74 = arith.addf %69, %73 : vector<16x8xf32>
    %cst_75 = arith.constant 0.000000e+00 : f32
    %75 = vector.broadcast %cst_75 : f32 to vector<16x8xf32>
    %76 = arith.maximumf %74, %75 : vector<16x8xf32>
    %c4_76 = arith.constant 4 : index
    %c0_77 = arith.constant 0 : index
    %77 = vector.load %arg19[%c4_76, %c0_77] : memref<20x8xf32, #tpu.memory_space<vmem>>, vector<16x8xf32>
    tpu.vector_store %arg19[%c4_76, %c0_77], %76 {strides = array<i32>} : memref<20x8xf32, #tpu.memory_space<vmem>>, vector<16x8xf32>,
    %c0_78 = arith.constant 0 : index
    %c0_79 = arith.constant 0 : index
    %78 = vector.load %arg11[%c0_78, %c0_79] : memref<1x8xf32, #tpu.memory_space<vmem>>, vector<1x8xf32>
    %79 = vector.shape_cast %78 : vector<1x8xf32> to vector<1x8xf32>
    %80 = vector.broadcast %79 : vector<1x8xf32> to vector<16x8xf32>
    %c0_80 = arith.constant 0 : index
    %c0_81 = arith.constant 0 : index
    %81 = vector.load %arg19[%c0_80, %c0_81] : memref<20x8xf32, #tpu.memory_space<vmem>>, vector<16x8xf32>
    %c0_82 = arith.constant 0 : index
    %c0_83 = arith.constant 0 : index
    %c0_84 = arith.constant 0 : index
    %82 = vector.load %arg10[%c0_82, %c0_83, %c0_84] : memref<3x8x8xf32, #tpu.memory_space<vmem>>, vector<1x8x8xf32>
    %83 = vector.shape_cast %82 : vector<1x8x8xf32> to vector<8x8xf32>
    %cst_85 = arith.constant dense<0.000000e+00> : vector<16x8xf32>
    %84 = tpu.matmul %81, %83, %cst_85 {dimension_numbers = #tpu.dot_dimension_numbers<[1], [0], [0], [1], [0, 0, 1, 1], [], []>} : vector<16x8xf32>, vector<8x8xf32>, vector<16x8xf32> -> vector<16x8xf32>
    %85 = arith.addf %80, %84 : vector<16x8xf32>
    %c2_86 = arith.constant 2 : index
    %c0_87 = arith.constant 0 : index
    %86 = vector.load %arg19[%c2_86, %c0_87] : memref<20x8xf32, #tpu.memory_space<vmem>>, vector<16x8xf32>
    %c1_88 = arith.constant 1 : index
    %c0_89 = arith.constant 0 : index
    %c0_90 = arith.constant 0 : index
    %87 = vector.load %arg10[%c1_88, %c0_89, %c0_90] : memref<3x8x8xf32, #tpu.memory_space<vmem>>, vector<1x8x8xf32>
    %88 = vector.shape_cast %87 : vector<1x8x8xf32> to vector<8x8xf32>
    %cst_91 = arith.constant dense<0.000000e+00> : vector<16x8xf32>
    %89 = tpu.matmul %86, %88, %cst_91 {dimension_numbers = #tpu.dot_dimension_numbers<[1], [0], [0], [1], [0, 0, 1, 1], [], []>} : vector<16x8xf32>, vector<8x8xf32>, vector<16x8xf32> -> vector<16x8xf32>
    %90 = arith.addf %85, %89 : vector<16x8xf32>
    %c4_92 = arith.constant 4 : index
    %c0_93 = arith.constant 0 : index
    %91 = vector.load %arg19[%c4_92, %c0_93] : memref<20x8xf32, #tpu.memory_space<vmem>>, vector<16x8xf32>
    %c2_94 = arith.constant 2 : index
    %c0_95 = arith.constant 0 : index
    %c0_96 = arith.constant 0 : index
    %92 = vector.load %arg10[%c2_94, %c0_95, %c0_96] : memref<3x8x8xf32, #tpu.memory_space<vmem>>, vector<1x8x8xf32>
    %93 = vector.shape_cast %92 : vector<1x8x8xf32> to vector<8x8xf32>
    %cst_97 = arith.constant dense<0.000000e+00> : vector<16x8xf32>
    %94 = tpu.matmul %91, %93, %cst_97 {dimension_numbers = #tpu.dot_dimension_numbers<[1], [0], [0], [1], [0, 0, 1, 1], [], []>} : vector<16x8xf32>, vector<8x8xf32>, vector<16x8xf32> -> vector<16x8xf32>
    %95 = arith.addf %90, %94 : vector<16x8xf32>
    %cst_98 = arith.constant 0.000000e+00 : f32
    %96 = vector.broadcast %cst_98 : f32 to vector<16x8xf32>
    %97 = arith.maximumf %95, %96 : vector<16x8xf32>
    %98 = arith.addf %97, %55 : vector<16x8xf32>
    %cst_99 = arith.constant 0.000000e+00 : f32
    %99 = vector.broadcast %cst_99 : f32 to vector<16x8xf32>
    %100 = arith.maximumf %98, %99 : vector<16x8xf32>
    %c0_100 = arith.constant 0 : index
    %c0_101 = arith.constant 0 : index
    %101 = vector.load %arg12[%c0_100, %c0_101] : memref<8x32xf32, #tpu.memory_space<vmem>>, vector<8x32xf32>
    %cst_102 = arith.constant dense<0.000000e+00> : vector<16x32xf32>
    %102 = tpu.matmul %100, %101, %cst_102 {dimension_numbers = #tpu.dot_dimension_numbers<[1], [0], [0], [1], [0, 0, 1, 1], [], []>} : vector<16x8xf32>, vector<8x32xf32>, vector<16x32xf32> -> vector<16x32xf32>
    %c0_103 = arith.constant 0 : index
    %c0_104 = arith.constant 0 : index
    %103 = vector.load %arg13[%c0_103, %c0_104] : memref<1x32xf32, #tpu.memory_space<vmem>>, vector<1x32xf32>
    %104 = vector.broadcast %103 : vector<1x32xf32> to vector<16x32xf32>
    %105 = arith.addf %102, %104 : vector<16x32xf32>
    %cst_105 = arith.constant 0.000000e+00 : f32
    %106 = vector.broadcast %cst_105 : f32 to vector<16x32xf32>
    %107 = arith.maximumf %105, %106 : vector<16x32xf32>
    %c0_106 = arith.constant 0 : index
    %c0_107 = arith.constant 0 : index
    %108 = vector.load %arg14[%c0_106, %c0_107] : memref<32x16xf32, #tpu.memory_space<vmem>>, vector<32x16xf32>
    %cst_108 = arith.constant dense<0.000000e+00> : vector<16x16xf32>
    %109 = tpu.matmul %107, %108, %cst_108 {dimension_numbers = #tpu.dot_dimension_numbers<[1], [0], [0], [1], [0, 0, 1, 1], [], []>} : vector<16x32xf32>, vector<32x16xf32>, vector<16x16xf32> -> vector<16x16xf32>
    %c0_109 = arith.constant 0 : index
    %c0_110 = arith.constant 0 : index
    %110 = vector.load %arg15[%c0_109, %c0_110] : memref<1x16xf32, #tpu.memory_space<vmem>>, vector<1x16xf32>
    %111 = vector.broadcast %110 : vector<1x16xf32> to vector<16x16xf32>
    %112 = arith.addf %109, %111 : vector<16x16xf32>
    %cst_111 = arith.constant 0.000000e+00 : f32
    %113 = vector.broadcast %cst_111 : f32 to vector<16x16xf32>
    %114 = arith.maximumf %112, %113 : vector<16x16xf32>
    %c0_112 = arith.constant 0 : index
    %c0_113 = arith.constant 0 : index
    %115 = vector.load %arg16[%c0_112, %c0_113] : memref<16x5xf32, #tpu.memory_space<vmem>>, vector<16x5xf32>
    %cst_114 = arith.constant dense<0.000000e+00> : vector<16x5xf32>
    %116 = tpu.matmul %114, %115, %cst_114 {dimension_numbers = #tpu.dot_dimension_numbers<[1], [0], [0], [1], [0, 0, 1, 1], [], []>} : vector<16x16xf32>, vector<16x5xf32>, vector<16x5xf32> -> vector<16x5xf32>
    %c0_115 = arith.constant 0 : index
    %c0_116 = arith.constant 0 : index
    %117 = vector.load %arg17[%c0_115, %c0_116] : memref<1x5xf32, #tpu.memory_space<vmem>>, vector<1x5xf32>
    %118 = vector.broadcast %117 : vector<1x5xf32> to vector<16x5xf32>
    %119 = arith.addf %116, %118 : vector<16x5xf32>
    %c0_117 = arith.constant 0 : index
    %c0_118 = arith.constant 0 : index
    %c0_119 = arith.constant 0 : index
    %120 = vector.load %arg18[%c0_117, %c0_118, %c0_119] : memref<1x16x5xf32, #tpu.memory_space<vmem>>, vector<1x16x5xf32>
    %121 = vector.shape_cast %120 : vector<1x16x5xf32> to vector<16x5xf32>
    %122 = vector.shape_cast %119 : vector<16x5xf32> to vector<1x16x5xf32>
    tpu.vector_store %arg18[%c0_117, %c0_118, %c0_119], %122 {strides = array<i32>} : memref<1x16x5xf32, #tpu.memory_space<vmem>>, vector<1x16x5xf32>,
    return
  }
  func.func @transform_0(%arg0: i32) -> (i32, i32, i32) {
    %c0_i32 = arith.constant 0 : i32
    %c0_i32_0 = arith.constant 0 : i32
    %c0_i32_1 = arith.constant 0 : i32
    return %arg0, %c0_i32, %c0_i32_0 : i32, i32, i32
  }
  func.func @transform_1(%arg0: i32) -> (i32, i32, i32) {
    %c0_i32 = arith.constant 0 : i32
    %c0_i32_0 = arith.constant 0 : i32
    %c0_i32_1 = arith.constant 0 : i32
    %c0_i32_2 = arith.constant 0 : i32
    return %c0_i32, %c0_i32_0, %c0_i32_1 : i32, i32, i32
  }
  func.func @transform_2(%arg0: i32) -> (i32, i32) {
    %c0_i32 = arith.constant 0 : i32
    %c0_i32_0 = arith.constant 0 : i32
    %c0_i32_1 = arith.constant 0 : i32
    return %c0_i32, %c0_i32_0 : i32, i32
  }
  func.func @transform_3(%arg0: i32) -> (i32, i32, i32) {
    %c0_i32 = arith.constant 0 : i32
    %c0_i32_0 = arith.constant 0 : i32
    %c0_i32_1 = arith.constant 0 : i32
    %c0_i32_2 = arith.constant 0 : i32
    return %c0_i32, %c0_i32_0, %c0_i32_1 : i32, i32, i32
  }
  func.func @transform_4(%arg0: i32) -> (i32, i32) {
    %c0_i32 = arith.constant 0 : i32
    %c0_i32_0 = arith.constant 0 : i32
    %c0_i32_1 = arith.constant 0 : i32
    return %c0_i32, %c0_i32_0 : i32, i32
  }
  func.func @transform_5(%arg0: i32) -> (i32, i32, i32) {
    %c0_i32 = arith.constant 0 : i32
    %c0_i32_0 = arith.constant 0 : i32
    %c0_i32_1 = arith.constant 0 : i32
    %c0_i32_2 = arith.constant 0 : i32
    return %c0_i32, %c0_i32_0, %c0_i32_1 : i32, i32, i32
  }
  func.func @transform_6(%arg0: i32) -> (i32, i32) {
    %c0_i32 = arith.constant 0 : i32
    %c0_i32_0 = arith.constant 0 : i32
    %c0_i32_1 = arith.constant 0 : i32
    return %c0_i32, %c0_i32_0 : i32, i32
  }
  func.func @transform_7(%arg0: i32) -> (i32, i32, i32) {
    %c0_i32 = arith.constant 0 : i32
    %c0_i32_0 = arith.constant 0 : i32
    %c0_i32_1 = arith.constant 0 : i32
    %c0_i32_2 = arith.constant 0 : i32
    return %c0_i32, %c0_i32_0, %c0_i32_1 : i32, i32, i32
  }
  func.func @transform_8(%arg0: i32) -> (i32, i32) {
    %c0_i32 = arith.constant 0 : i32
    %c0_i32_0 = arith.constant 0 : i32
    %c0_i32_1 = arith.constant 0 : i32
    return %c0_i32, %c0_i32_0 : i32, i32
  }
  func.func @transform_9(%arg0: i32) -> (i32, i32, i32) {
    %c0_i32 = arith.constant 0 : i32
    %c0_i32_0 = arith.constant 0 : i32
    %c0_i32_1 = arith.constant 0 : i32
    %c0_i32_2 = arith.constant 0 : i32
    return %c0_i32, %c0_i32_0, %c0_i32_1 : i32, i32, i32
  }
  func.func @transform_10(%arg0: i32) -> (i32, i32) {
    %c0_i32 = arith.constant 0 : i32
    %c0_i32_0 = arith.constant 0 : i32
    %c0_i32_1 = arith.constant 0 : i32
    return %c0_i32, %c0_i32_0 : i32, i32
  }
  func.func @transform_11(%arg0: i32) -> (i32, i32) {
    %c0_i32 = arith.constant 0 : i32
    %c0_i32_0 = arith.constant 0 : i32
    %c0_i32_1 = arith.constant 0 : i32
    return %c0_i32, %c0_i32_0 : i32, i32
  }
  func.func @transform_12(%arg0: i32) -> (i32, i32) {
    %c0_i32 = arith.constant 0 : i32
    %c0_i32_0 = arith.constant 0 : i32
    %c0_i32_1 = arith.constant 0 : i32
    return %c0_i32, %c0_i32_0 : i32, i32
  }
  func.func @transform_13(%arg0: i32) -> (i32, i32) {
    %c0_i32 = arith.constant 0 : i32
    %c0_i32_0 = arith.constant 0 : i32
    %c0_i32_1 = arith.constant 0 : i32
    return %c0_i32, %c0_i32_0 : i32, i32
  }
  func.func @transform_14(%arg0: i32) -> (i32, i32) {
    %c0_i32 = arith.constant 0 : i32
    %c0_i32_0 = arith.constant 0 : i32
    %c0_i32_1 = arith.constant 0 : i32
    return %c0_i32, %c0_i32_0 : i32, i32
  }
  func.func @transform_15(%arg0: i32) -> (i32, i32) {
    %c0_i32 = arith.constant 0 : i32
    %c0_i32_0 = arith.constant 0 : i32
    %c0_i32_1 = arith.constant 0 : i32
    return %c0_i32, %c0_i32_0 : i32, i32
  }
  func.func @transform_16(%arg0: i32) -> (i32, i32) {
    %c0_i32 = arith.constant 0 : i32
    %c0_i32_0 = arith.constant 0 : i32
    %c0_i32_1 = arith.constant 0 : i32
    return %c0_i32, %c0_i32_0 : i32, i32
  }
  func.func @transform_17(%arg0: i32) -> (i32, i32, i32) {
    %c0_i32 = arith.constant 0 : i32
    %c0_i32_0 = arith.constant 0 : i32
    %c0_i32_1 = arith.constant 0 : i32
    return %arg0, %c0_i32, %c0_i32_0 : i32, i32, i32
  }
}

</mosaic_0001>

<bundles_post_ra>
// kernel: tpu_custom_call.1
= control target key start
LH: loop header
LB: loop body
LE: loop exit
PB: predicated region body
PF: predicated region fallthrough
CT: control target
= control target key end

     0   :  { %s2435_s24 = smov 0   ;;  %s2601_s0 = inlined_call_operand.vmem [shape: f32[2,16,4], index: 0, kind: input, shape index: {}]   ;;  %s2602_s1 = inlined_call_operand.vmem [shape: f32[3,4,8], index: 1, kind: input, shape index: {}]   ;;  %s2603_s2 = inlined_call_operand.vmem [shape: f32[1,8], index: 2, kind: input, shape index: {}]   ;;  %s2604_s3 = inlined_call_operand.vmem [shape: f32[3,8,8], index: 3, kind: input, shape index: {}]   ;;  %s2605_s4 = inlined_call_operand.vmem [shape: f32[1,8], index: 4, kind: input, shape index: {}]   ;;  %s2606_s5 = inlined_call_operand.vmem [shape: f32[1,4,8], index: 5, kind: input, shape index: {}]   ;;  %s2607_s6 = inlined_call_operand.vmem [shape: f32[1,8], index: 6, kind: input, shape index: {}]   ;;  %s2608_s7 = inlined_call_operand.vmem [shape: f32[3,8,8], index: 7, kind: input, shape index: {}]   ;;  %s2609_s8 = inlined_call_operand.vmem [shape: f32[1,8], index: 8, kind: input, shape index: {}]   ;;  %s2610_s9 = inlined_call_operand.vmem [shape: f32[3,8,8], index: 9, kind: input, shape index: {}]   ;;  %s2611_s10 = inlined_call_operand.vmem [shape: f32[1,8], index: 10, kind: input, shape index: {}]   ;;  %s2612_s11 = inlined_call_operand.vmem [shape: f32[8,32], index: 11, kind: input, shape index: {}]   ;;  %s2613_s12 = inlined_call_operand.vmem [shape: f32[1,32], index: 12, kind: input, shape index: {}]   ;;  %s2614_s13 = inlined_call_operand.vmem [shape: f32[32,16], index: 13, kind: input, shape index: {}]   ;;  %s2615_s14 = inlined_call_operand.vmem [shape: f32[1,16], index: 14, kind: input, shape index: {}]   ;;  %s2616_s15 = inlined_call_operand.vmem [shape: f32[16,5], index: 15, kind: input, shape index: {}]   ;;  %s2617_s16 = inlined_call_operand.vmem [shape: f32[1,5], index: 16, kind: input, shape index: {}]   ;;  %s2618_s17 = inlined_call_operand.vmem [shape: f32[2,16,5], index: 17, kind: output, shape index: {}]  }
   0x1   :  { %2620 = sst [smem:[#allocation3_spill]] %s2601_s0 }
   0x2   :  { %2621 = sst [smem:[#allocation4_spill]] %s2602_s1 }
   0x3 LB: > { %s2086_s25 = sadd.s32 4294967295, %s2342_s24   ;;  %p2090_p0 = scmp.ge.s32.totalorder %s2342_s24, 1  ;;  %s2342_s24 = sphi %s2435_s24, %s27_s24  }
   0x4   : > { %p487_p1 = scmp.lt.s32.totalorder %s2342_s24, 3 }
   0x6   : > { %p488_p2 = pnand %p2090_p0, %p487_p1 }
   0x7   : > { %s2622_s28 = sld [smem:[#allocation4_spill]] (!%p488_p2)  ;;  %vm572_vm0 = vcmask (!%p488_p2), 1043456   ;;  %p539_p3 = scmp.lt.s32.totalorder (!%p488_p2), %s2086_s25, 1  ;;  %vm549_vm1 = vcmask (!%p488_p2), 60416   ;;  %v2344_v1 = vmov (!%p488_p2), 0.0   ;;  %vm553_vm2 = vcmask (!%p488_p2), 31744  }
   0x8   : > { %491 = sbr.rel (%p488_p2) target bundleno = 1648 (0x670), region = 88  ;;  %550 = vst.msk [vmem:[#allocation2] sm:$0xf] (!%p488_p2), %vm549_vm1, %v2344_v1  ;;  %s2623_s1 = sld [smem:[#allocation3_spill]] (!%p488_p2)  ;;  %v847_v12 = vld [vmem:[%s2604_s3] sm:$0xff] (!%p488_p2)  ;;  %v2110_v13 = vld [vmem:[%s2604_s3 + $0x8] sm:$0xff] (!%p488_p2) }
   0x9   : > { %2218 = vmatprep.subr.mxu1 (!%p488_p2), %v847_v12  ;;  %v1114_v14 = vld [vmem:[%s2606_s5] sm:$0xf] (!%p488_p2)  ;;  %vm835_vm3 = vcmask (!%p488_p2), 64512   ;;  %v2113_v24 = vld [vmem:[%s2604_s3 + $0x10] sm:$0xff] (!%p488_p2)  ;;  %v2123_v32 = vld [vmem:[%s2608_s7 + $0x8] sm:$0xff] (!%p488_p2)  ;;  %vm1853_vm4 = vcmask (!%p488_p2), 261120  }
   0xa   : > { %2219 = vmatpush3.msra.mxu1 (!%p488_p2), %v847_v12  ;;  %v2095_v15 = vld [vmem:[%s2603_s2] ss:$0 sm:$0xff] (!%p488_p2)  ;;  %v2126_v49 = vld [vmem:[%s2608_s7 + $0x10] sm:$0xff] (!%p488_p2)  ;;  %v2132_v55 = vld [vmem:[%s2610_s9 + $0x8] sm:$0xff] (!%p488_p2)  ;;  %vm1946_vm5 = vcmask (!%p488_p2), 130048   ;;  %vm2028_vm6 = vcmask (!%p488_p2), 39936  }
   0xb   : > { %2223 = vmatprep.subr.mxu1 (!%p488_p2), %v2110_v13  ;;  %v1216_v31 = vld [vmem:[%s2608_s7] sm:$0xff] (!%p488_p2)  ;;  %v2135_v1 = vld [vmem:[%s2610_s9 + $0x10] sm:$0xff] (!%p488_p2) }
   0xc   : > { %v2107_v33 = vld [vmem:[%s2605_s4] ss:$0 sm:$0xff] (!%p488_p2) }
   0xd   : > { %v565_v0 = vld [vmem:[%s2622_s28] sm:$0xf] (!%p488_p2)  ;;  %v2099_v2 = vld [vmem:[%s2622_s28 + $0x4] sm:$0xf] (!%p488_p2)  ;;  %v2103_v8 = vld [vmem:[%s2622_s28 + $0x8] sm:$0xf] (!%p488_p2) }
   0xe   : > { %2203 = vmatprep.subr.msk.mxu0 (!%p488_p2), %vm572_vm0, %v565_v0  ;;  %v2116_v34 = vld [vmem:[%s2607_s6] ss:$0 sm:$0xff] (!%p488_p2) }
   0xf   : > { %2204 = vmatpush3.msk.msra.mxu0 %vm572_vm0, %v565_v0  ;;  %s2625_s25 = smov (!%p539_p3, %s2086_s25), 1  ;;  %v1487_v54 = vld [vmem:[%s2610_s9] sm:$0xff] }
  0x10   : > { %2208 = vmatprep.subr.msk.mxu0 %vm572_vm0, %v2099_v2  ;;  %s2149_s30 = sshll.u32 %s2625_s25, 4  ;;  %v2120_v56 = vld [vmem:[%s2609_s8] ss:$0 sm:$0xff] }
  0x11   : > { %s543_s20 = scalar_lea.vmem %s2623_s1, %s2149_s30 }
  0x12   : > { %v551_v3 = vld [vmem:[%s543_s20] sm:$0xff]  ;;  %v552_v4 = vld [vmem:[%s543_s20 + $0x8] sm:$0xff]  ;;  %s548_s20 = scalar_lea.vmem %s2618_s17, %s2149_s30 }
  0x13   : > { %554 = vst.msk [vmem:[#allocation2 + $0x4] sm:$0xff] %vm553_vm2, %v551_v3  ;;  %555 = vst.msk [vmem:[#allocation2 + $0xc] sm:$0xff] %vm553_vm2, %v552_v4 }
  0x1a   : > { %v563_v5 = vld [vmem:[#allocation2 + $0x2] sm:$0xff]  ;;  %v564_v6 = vld [vmem:[#allocation2 + $0xa] sm:$0xff] }
  0x1b   : > { %v653_v7 = vld [vmem:[#allocation2 + $0x3] sm:$0xff]  ;;  %2205 = vmatprep.mubr.msk.f32.mxu0 %vm553_vm2, %v563_v5  ;;  %v654_v9 = vld [vmem:[#allocation2 + $0xb] sm:$0xff] }
  0x1c   : > { %2206 = vmatmul.mubr.msk.f32.vlgmr.msra.gmra.mrb[0].mxu0 %vm553_vm2, %v564_v6  ;;  %v743_v10 = vld [vmem:[#allocation2 + $0x4] sm:$0xff]  ;;  %v744_v11 = vld [vmem:[#allocation2 + $0xc] sm:$0xff] }
  0x1d   : > { %2209 = vmatpush3.msk.msra.mxu0 %vm572_vm0, %v2099_v2  ;;  %2210 = vmatprep.mubr.msk.f32.mxu0 %vm553_vm2, %v653_v7  ;;  %v1751_v6 = vld [vmem:[%s2612_s11] sm:$0xff] }
  0x1e   : > { %2213 = vmatprep.subr.msk.mxu0 %vm572_vm0, %v2103_v8  ;;  %v1842_v7 = vld [vmem:[%s2614_s13] sm:$0xff] }
  0x24   : > { %2211 = vmatmul.mubr.msk.f32.vlgmr.msra.gmra.mrb[0].mxu0 %vm553_vm2, %v654_v9 }
  0x25   : > { %2214 = vmatpush3.msk.msra.mxu0 %vm572_vm0, %v2103_v8  ;;  %2215 = vmatprep.mubr.msk.f32.mxu0 %vm553_vm2, %v743_v10  ;;  %v1843_v8 = vld [vmem:[%s2614_s13 + $0x8] sm:$0xff]  ;;  %v2129_v10 = vld [vmem:[%s2611_s10] ss:$0 sm:$0xff] }
  0x26   : > { %2233 = vmatprep.subr.msk.mxu0 %vm572_vm0, %v1114_v14  ;;  %v2291_v9 = vpack.c.bf16 %v1843_v8, %v1842_v7 }
  0x2c   : > { %2216 = vmatmul.mubr.msk.f32.vlgmr.msra.gmra.mrb[0].mxu0 %vm553_vm2, %v744_v11 }
  0x2d   : > { %2235 = vmatprep.mubr.msk.f32.mxu0 %vm553_vm2, %v551_v3  ;;  %2234 = vmatpush3.msk.msra.mxu0 %vm572_vm0, %v1114_v14 }
  0x2e   : > { %2253 = vmatprep.subr.mxu0 %v1487_v54 }
  0x30   : > { %2236 = vmatmul.mubr.msk.f32.vlgmr.msra.gmra.mrb[2].mxu0 %vm553_vm2, %v552_v4 }
  0x31   : > { %2254 = vmatpush3.msra.mxu0 %v1487_v54 }
  0x32   : > { %2258 = vmatprep.subr.mxu0 %v2132_v55 }
  0xff   : > { %v2217_v16 = vpop.f32.mrb[0].mxu0 }
 0x100   : > { %v2303_v17 = vadd.f32 %v2217_v16, %v2095_v15  ;;  %v822_v18 = vpop.f32.mrb[1].mxu0 }
 0x101   : > { %v2304_v19 = vadd.f32 %v2095_v15, %v822_v18 }
 0x102   : > { %v834_v20 = vmax.f32 %v2303_v17, 0.0 }
 0x103   : > { %v833_v21 = vmax.f32 %v2304_v19, 0.0  ;;  %v2237_v29 = vpop.f32.mrb[2].mxu0 }
 0x104   : > { %837 = vst.msk [vmem:[#allocation2 + $0xc] sm:$0xff] %vm835_vm3, %v834_v20  ;;  %v1190_v30 = vpop.f32.mrb[3].mxu0  ;;  %v1200_v38 = vadd.f32 %v2237_v29, %v2116_v34 }
 0x105   : > { %836 = vst.msk [vmem:[#allocation2 + $0x4] sm:$0xff] %vm835_vm3, %v833_v21  ;;  %v1199_v40 = vadd.f32 %v2116_v34, %v1190_v30  ;;  %v1844_v21 = vld [vmem:[%s2614_s13 + $0x10] sm:$0xff]  ;;  %v2141_v34 = vld [vmem:[%s2615_s14] ss:$0 sm:$0xff] }
 0x10b   : > { %v1019_v28 = vld [vmem:[#allocation2 + $0xc] sm:$0xff] }
 0x10c   : > { %v845_v22 = vld [vmem:[#allocation2 + $0x2] sm:$0xff]  ;;  %v846_v23 = vld [vmem:[#allocation2 + $0xa] sm:$0xff] }
 0x10d   : > { %2220 = vmatprep.mubr.msk.f32.mxu1 %vm835_vm3, %v845_v22  ;;  %v931_v25 = vld [vmem:[#allocation2 + $0x3] sm:$0xff]  ;;  %v932_v26 = vld [vmem:[#allocation2 + $0xb] sm:$0xff]  ;;  %v1845_v22 = vld [vmem:[%s2614_s13 + $0x18] sm:$0xff] }
 0x10e   : > { %2221 = vmatmul.mubr.msk.f32.vlgmr.msra.gmra.mrb[0].mxu1 %vm835_vm3, %v846_v23  ;;  %v1018_v27 = vld [vmem:[#allocation2 + $0x4] sm:$0xff]  ;;  %v2295_v23 = vpack.c.bf16 %v1845_v22, %v1844_v21 }
 0x10f   : > { %2224 = vmatpush3.msra.mxu1 %v2110_v13  ;;  %2225 = vmatprep.mubr.msk.f32.mxu1 %vm835_vm3, %v931_v25 }
 0x110   : > { %2228 = vmatprep.subr.mxu1 %v2113_v24 }
 0x116   : > { %2226 = vmatmul.mubr.msk.f32.vlgmr.msra.gmra.mrb[0].mxu1 %vm835_vm3, %v932_v26 }
 0x117   : > { %2229 = vmatpush3.msra.mxu1 %v2113_v24  ;;  %2230 = vmatprep.mubr.msk.f32.mxu1 %vm835_vm3, %v1018_v27  ;;  %v2138_v24 = vld [vmem:[%s2613_s12] ss:$0 sm:$0xff] }
 0x118   : > { %2238 = vmatprep.subr.mxu1 %v1216_v31 }
 0x11e   : > { %2231 = vmatmul.mubr.msk.f32.vlgmr.msra.gmra.mrb[0].mxu1 %vm835_vm3, %v1019_v28 }
 0x11f   : > { %2239 = vmatpush3.msra.mxu1 %v1216_v31  ;;  %v1937_v31 = vld [vmem:[%s2616_s15] sm:$0xff] }
 0x120   : > { %2243 = vmatprep.subr.mxu1 %v2123_v32 }
 0x1f1   : > { %v2232_v35 = vpop.f32.mrb[0].mxu1 }
 0x1f2   : > { %v2305_v36 = vadd.f32 %v2232_v35, %v2107_v33  ;;  %v1094_v37 = vpop.f32.mrb[1].mxu1 }
 0x1f3   : > { %v2306_v39 = vadd.f32 %v2107_v33, %v1094_v37 }
 0x1f4   : > { %v1106_v41 = vmax.f32 %v2305_v36, 0.0 }
 0x1f5   : > { %v1105_v42 = vmax.f32 %v2306_v39, 0.0 }
 0x1f6   : > { %v2513_v43 = vadd.f32 %v1200_v38, %v1106_v41  ;;  %v2144_v41 = vld [vmem:[%s2617_s16] ss:$0 sm:$0xff] }
 0x1f7   : > { %v2515_v44 = vadd.f32 %v1199_v40, %v1105_v42 }
 0x1f8   : > { %v1204_v45 = vmax.f32 %v2513_v43, 0.0 }
 0x1f9   : > { %v1203_v46 = vmax.f32 %v2515_v44, 0.0 }
 0x1fa   : > { %1206 = vst.msk [vmem:[#allocation2 + $0xc] sm:$0xff] %vm835_vm3, %v1204_v45 }
 0x1fb   : > { %1205 = vst.msk [vmem:[#allocation2 + $0x4] sm:$0xff] %vm835_vm3, %v1203_v46 }
 0x201   : > { %v1388_v53 = vld [vmem:[#allocation2 + $0xc] sm:$0xff] }
 0x202   : > { %v1214_v47 = vld [vmem:[#allocation2] sm:$0xff]  ;;  %v1215_v48 = vld [vmem:[#allocation2 + $0x8] sm:$0xff] }
 0x203   : > { %2240 = vmatprep.mubr.msk.f32.mxu1 %vm835_vm3, %v1214_v47  ;;  %v1300_v50 = vld [vmem:[#allocation2 + $0x2] sm:$0xff]  ;;  %v1301_v51 = vld [vmem:[#allocation2 + $0xa] sm:$0xff] }
 0x204   : > { %2241 = vmatmul.mubr.msk.f32.vlgmr.msra.gmra.mrb[2].mxu1 %vm835_vm3, %v1215_v48  ;;  %v1387_v52 = vld [vmem:[#allocation2 + $0x4] sm:$0xff] }
 0x205   : > { %2244 = vmatpush3.msra.mxu1 %v2123_v32  ;;  %2245 = vmatprep.mubr.msk.f32.mxu1 %vm835_vm3, %v1300_v50  ;;  %v1938_v32 = vld [vmem:[%s2616_s15 + $0x8] sm:$0xff] }
 0x206   : > { %2248 = vmatprep.subr.mxu1 %v2126_v49  ;;  %v2299_v33 = vpack.c.bf16 %v1938_v32, %v1937_v31 }
 0x20c   : > { %2246 = vmatmul.mubr.msk.f32.vlgmr.msra.gmra.mrb[2].mxu1 %vm835_vm3, %v1301_v51 }
 0x20d   : > { %2249 = vmatpush3.msra.mxu1 %v2126_v49  ;;  %2250 = vmatprep.mubr.msk.f32.mxu1 %vm835_vm3, %v1387_v52 }
 0x20e   : > { %2268 = vmatprep.subr.mxu1 %v1751_v6 }
 0x214   : > { %2251 = vmatmul.mubr.msk.f32.vlgmr.msra.gmra.mrb[2].mxu1 %vm835_vm3, %v1388_v53 }
 0x215   : > { %2269 = vmatpush3.msra.mxu1 %v1751_v6 }
 0x216   : > { %2300 = vmatprep.subr.bf16.mxu1 %v2299_v33 }
 0x2e7   : > { %v2252_v57 = vpop.f32.mrb[2].mxu1 }
 0x2e8   : > { %v2307_v58 = vadd.f32 %v2252_v57, %v2120_v56  ;;  %v1463_v59 = vpop.f32.mrb[3].mxu1 }
 0x2e9   : > { %v2308_v60 = vadd.f32 %v2120_v56, %v1463_v59 }
 0x2ea   : > { %v1475_v61 = vmax.f32 %v2307_v58, 0.0 }
 0x2eb   : > { %v1474_v62 = vmax.f32 %v2308_v60, 0.0 }
 0x2ec   : > { %1477 = vst.msk [vmem:[#allocation2 + $0xc] sm:$0xff] %vm835_vm3, %v1475_v61 }
 0x2ed   : > { %1476 = vst.msk [vmem:[#allocation2 + $0x4] sm:$0xff] %vm835_vm3, %v1474_v62 }
 0x2f3   : > { %v1659_v5 = vld [vmem:[#allocation2 + $0xc] sm:$0xff] }
 0x2f4   : > { %v1485_v63 = vld [vmem:[#allocation2] sm:$0xff]  ;;  %v1486_v0 = vld [vmem:[#allocation2 + $0x8] sm:$0xff] }
 0x2f5   : > { %2255 = vmatprep.mubr.msk.f32.mxu0 %vm835_vm3, %v1485_v63  ;;  %v1571_v2 = vld [vmem:[#allocation2 + $0x2] sm:$0xff]  ;;  %v1572_v3 = vld [vmem:[#allocation2 + $0xa] sm:$0xff] }
 0x2f6   : > { %2256 = vmatmul.mubr.msk.f32.vlgmr.msra.gmra.mrb[4].mxu0 %vm835_vm3, %v1486_v0  ;;  %v1658_v4 = vld [vmem:[#allocation2 + $0x4] sm:$0xff] }
 0x2f7   : > { %2259 = vmatpush3.msra.mxu0 %v2132_v55  ;;  %2260 = vmatprep.mubr.msk.f32.mxu0 %vm835_vm3, %v1571_v2 }
 0x2f8   : > { %2263 = vmatprep.subr.mxu0 %v2135_v1 }
 0x2fe   : > { %2261 = vmatmul.mubr.msk.f32.vlgmr.msra.gmra.mrb[4].mxu0 %vm835_vm3, %v1572_v3 }
 0x2ff   : > { %2264 = vmatpush3.msra.mxu0 %v2135_v1  ;;  %2265 = vmatprep.mubr.msk.f32.mxu0 %vm835_vm3, %v1658_v4 }
 0x300   : > { %2292 = vmatprep.subr.bf16.mxu0 %v2291_v9 }
 0x306   : > { %2266 = vmatmul.mubr.msk.f32.vlgmr.msra.gmra.mrb[4].mxu0 %vm835_vm3, %v1659_v5 }
 0x307   : > { %2294 = vmatpush3.bf16.msra.mxu0 %v2291_v9 }
 0x308   : > { %2296 = vmatprep.subr.bf16.mxu0 %v2295_v23 }
 0x30b   : > { %2298 = vmatpush3.bf16.msra.mxu0 %v2295_v23 }
 0x3d9   : > { %v2267_v11 = vpop.f32.mrb[4].mxu0 }
 0x3da   : > { %v2309_v12 = vadd.f32 %v2267_v11, %v2129_v10  ;;  %v1734_v13 = vpop.f32.mrb[5].mxu0 }
 0x3db   : > { %v2310_v14 = vadd.f32 %v2129_v10, %v1734_v13 }
 0x3dc   : > { %v1746_v15 = vmax.f32 %v2309_v12, 0.0 }
 0x3dd   : > { %v1745_v16 = vmax.f32 %v2310_v14, 0.0 }
 0x3de   : > { %v1748_v17 = vadd.f32 %v1746_v15, %v1204_v45 }
 0x3df   : > { %v1747_v18 = vadd.f32 %v1745_v16, %v1203_v46 }
 0x3e0   : > { %v1750_v20 = vmax.f32 %v1748_v17, 0.0 }
 0x3e1   : > { %v1749_v19 = vmax.f32 %v1747_v18, 0.0 }
 0x3e3   : > { %2270 = vmatprep.mubr.msk.f32.mxu1 %vm835_vm3, %v1749_v19 }
 0x3e4   : > { %2271 = vmatmul.mubr.msk.f32.vlgmr.msra.gmra.mrb[4].mxu1 %vm835_vm3, %v1750_v20 }
 0x3e5   : > { %2302 = vmatpush3.bf16.msra.mxu1 %v2299_v33 }
 0x4b7   : > { %v2272_v25 = vpop.f32.mrb[4].mxu1 }
 0x4b8   : > { %v1837_v26 = vadd.f32 %v2272_v25, %v2138_v24  ;;  %v1831_v27 = vpop.f32.mrb[5].mxu1 }
 0x4b9   : > { %v1832_v28 = vadd.f32 %v2138_v24, %v1831_v27 }
 0x4ba   : > { %v1841_v30 = vmax.f32 %v1837_v26, 0.0 }
 0x4bb   : > { %v1840_v29 = vmax.f32 %v1832_v28, 0.0 }
 0x4bd   : > { %2281 = vmatprep.mubr.msk.f32.mxu0 %vm1853_vm4, %v1840_v29 }
 0x4be   : > { %2282 = vmatmul.mubr.msk.f32.vlgmr.msra.gmra.mrb[6].mxu0 %vm1853_vm4, %v1841_v30 }
 0x591   : > { %v2283_v35 = vpop.f32.mrb[6].mxu0 }
 0x592   : > { %v1932_v36 = vadd.f32 %v2283_v35, %v2141_v34  ;;  %v1926_v37 = vpop.f32.mrb[7].mxu0 }
 0x593   : > { %v1927_v38 = vadd.f32 %v2141_v34, %v1926_v37 }
 0x594   : > { %v1936_v40 = vmax.f32 %v1932_v36, 0.0 }
 0x595   : > { %v1935_v39 = vmax.f32 %v1927_v38, 0.0 }
 0x597   : > { %2288 = vmatprep.mubr.msk.f32.mxu1 %vm1946_vm5, %v1935_v39 }
 0x598   : > { %2289 = vmatmul.mubr.msk.f32.vlgmr.msra.gmra.mrb[6].mxu1 %vm1946_vm5, %v1936_v40 }
 0x66b   : > { %v2290_v42 = vpop.f32.mrb[6].mxu1 }
 0x66c   : > { %v2025_v43 = vadd.f32 %v2290_v42, %v2144_v41  ;;  %v2019_v44 = vpop.f32.mrb[7].mxu1 }
 0x66d   : > { %v2020_v45 = vadd.f32 %v2144_v41, %v2019_v44 }
 0x66e   : > { %2030 = vst.msk [vmem:[%s548_s20 + $0x8] sm:$0xff] %vm2028_vm6, %v2025_v43 }
 0x66f   : > { %2029 = vst.msk [vmem:[%s548_s20] sm:$0xff] %vm2028_vm6, %v2020_v45 }
 0x670 PF: > { %s27_s24 = sadd.s32 1, %s2342_s24  }
 0x671   : > { %p24_p4 = scmp.ge.s32.totalorder %s27_s24, 4  }
 0x673   :  { %26 = sbr.rel (!%p24_p4) target bundleno = 3 (0x3), region = 126 }

</bundles_post_ra>
